<compile_context>
chip_gen: v6e
topology: v6e:2x2x1
jax: 0.10.0
libtpu: 0.0.40
codegen_flags: <defaults>
</compile_context>

<pallas_src>
import jax
import jax.numpy as jnp
from jax.experimental import pallas as pl
from jax.experimental.pallas import tpu as pltpu


def _round_up(x, m):
    return ((x + m - 1) // m) * m


def _pad2(a, rows, cols):
    return jnp.pad(a, ((0, rows - a.shape[0]), (0, cols - a.shape[1])))


def _choose_tiles(N, tm, tk):
    """Clamp/align tiles: tm, tk multiples of 128, tm | tk, n_p = round_up(N, tk)."""
    n_min = _round_up(N, 128)
    tk = _round_up(min(tk, n_min), 128)
    tm = _round_up(min(tm, tk), 128)
    while tk % tm != 0:          # enforce tm | tk so padding never exceeds tk
        tm -= 128
    n_p = _round_up(N, tk)
    return tm, tk, n_p


def _vmem_limit_bytes(tm, tk, hid_p, out_p):
    # Double-buffered L tile + Z slab + output tile, resident W2/b2, f32 acc.
    est = 0
    est += 2 * tm * tk * 2          # L tiles (bf16)
    est += 2 * tk * hid_p * 2       # Z1 slabs (bf16)
    est += 2 * tm * out_p * 4       # output tiles (worst case f32)
    est += 2 * hid_p * out_p * 2    # W2 (bf16)
    est += 2 * out_p * 4            # b2 (f32)
    est += tm * hid_p * 4           # accumulator scratch (f32)
    # Generous headroom, but stay within v7x's 64 MiB physical VMEM.
    return min(max(2 * est + (8 << 20), 32 << 20), 64 << 20)


# ---------------------------------------------------------------------------
# Kernels
# ---------------------------------------------------------------------------

def _layer1_fused_kernel(l_ref, z1_ref, w2_ref, b2_ref, z2_ref, acc_ref):
    """acc += L_tile @ Z1_slab; finalize: Z2 = relu(acc) @ W2 + b2 (bf16)."""
    k = pl.program_id(1)

    @pl.when(k == 0)
    def _():
        acc_ref[...] = jnp.zeros_like(acc_ref)

    acc_ref[...] += jnp.dot(l_ref[...], z1_ref[...],
                            preferred_element_type=jnp.float32)

    @pl.when(k == pl.num_programs(1) - 1)
    def _():
        h1 = jnp.maximum(acc_ref[...], 0.0)
        z2 = jnp.dot(h1.astype(jnp.bfloat16), w2_ref[...],
                     preferred_element_type=jnp.float32) + b2_ref[...]
        z2_ref[...] = z2.astype(z2_ref.dtype)


def _propagate_kernel(l_ref, z_ref, o_ref):
    """out_tile (f32, resident across k) accumulates L_tile @ Z_slab."""
    k = pl.program_id(1)

    @pl.when(k == 0)
    def _():
        o_ref[...] = jnp.zeros_like(o_ref)

    o_ref[...] += jnp.dot(l_ref[...], z_ref[...],
                          preferred_element_type=jnp.float32)


# ---------------------------------------------------------------------------
# pallas_call wrappers
# ---------------------------------------------------------------------------

def _layer1_fused(L_p, Z1_p, W2_p, b2_p, *, tm, tk, vmem_limit):
    n_p = L_p.shape[0]
    hid_p = Z1_p.shape[1]
    out_p = W2_p.shape[1]
    grid = (n_p // tm, n_p // tk)

    return pl.pallas_call(
        _layer1_fused_kernel,
        out_shape=jax.ShapeDtypeStruct((n_p, out_p), jnp.bfloat16),
        grid_spec=pltpu.PrefetchScalarGridSpec(
            num_scalar_prefetch=0,
            grid=grid,
            in_specs=[
                pl.BlockSpec((tm, tk), lambda i, k: (i, k)),        # L tile (bf16)
                pl.BlockSpec((tk, hid_p), lambda i, k: (k, 0)),     # Z1 slab (bf16)
                pl.BlockSpec((hid_p, out_p), lambda i, k: (0, 0)),  # W2 (resident)
                pl.BlockSpec((1, out_p), lambda i, k: (0, 0)),      # b2 (resident)
            ],
            out_specs=pl.BlockSpec((tm, out_p), lambda i, k: (i, 0)),
            scratch_shapes=[pltpu.VMEM((tm, hid_p), jnp.float32)],
        ),
        compiler_params=pltpu.CompilerParams(
            dimension_semantics=("parallel", "arbitrary"),
            vmem_limit_bytes=vmem_limit),
    )(L_p, Z1_p, W2_p, b2_p)


def _propagate(L_p, Z_p, *, tm, tk, vmem_limit):
    n_p = L_p.shape[0]
    f = Z_p.shape[1]
    grid = (n_p // tm, n_p // tk)

    return pl.pallas_call(
        _propagate_kernel,
        out_shape=jax.ShapeDtypeStruct((n_p, f), jnp.float32),
        grid_spec=pltpu.PrefetchScalarGridSpec(
            num_scalar_prefetch=0,
            grid=grid,
            in_specs=[
                pl.BlockSpec((tm, tk), lambda i, k: (i, k)),   # L tile (bf16)
                pl.BlockSpec((tk, f), lambda i, k: (k, 0)),    # Z2 slab (bf16)
            ],
            out_specs=pl.BlockSpec((tm, f), lambda i, k: (i, 0)),
        ),
        compiler_params=pltpu.CompilerParams(
            dimension_semantics=("parallel", "arbitrary"),
            vmem_limit_bytes=vmem_limit),
    )(L_p, Z_p)


def hgnn_forward(L, X, W1, b1, W2, b2, *, tm=512, tk=1024):
    """HGNN forward: X2 = L @ (relu(L @ (X @ W1 + b1)) @ W2 + b2)."""
    N, _ = X.shape
    hidden = W1.shape[1]
    out_size = W2.shape[1]

    tm, tk, n_p = _choose_tiles(N, tm, tk)
    hid_p = _round_up(hidden, 128)
    out_p = _round_up(out_size, 128)
    vmem_limit = _vmem_limit_bytes(tm, tk, hid_p, out_p)

    # Precompute the first linear ONCE (tiny GEMM, f32) and hand the heavy
    # propagation kernels bf16 operands only.  Zero padding is exact: padded
    # rows/cols of L are zero and padded W columns / b entries are zero.
    Z1 = X.astype(jnp.float32) @ W1.astype(jnp.float32) + b1.astype(jnp.float32)
    Z1_p = _pad2(Z1, n_p, hid_p).astype(jnp.bfloat16)

    L_p = _pad2(L.astype(jnp.float32), n_p, n_p).astype(jnp.bfloat16)
    W2_p = _pad2(W2, hid_p, out_p).astype(jnp.bfloat16)
    b2_p = _pad2(b2, 1, out_p).astype(jnp.float32)

    # Layer 1 (+ fused second linear):  Z2 = relu(L @ Z1) @ W2 + b2   (bf16)
    Z2_p = _layer1_fused(L_p, Z1_p, W2_p, b2_p, tm=tm, tk=tk,
                         vmem_limit=vmem_limit)
    # Layer 2: pure propagation          out = L @ Z2                  (f32)
    out_p_arr = _propagate(L_p, Z2_p, tm=tm, tk=tk, vmem_limit=vmem_limit)

    return out_p_arr[:N, :out_size]


def build_laplacian(H):
    # L = D_v^{-1/2} H B D_e^{-1} H^T D_v^{-1/2}, with B = I, done as row/column
    # scalings (no dense diag / identity materialization).
    d_V = H.sum(axis=1)
    d_E = H.sum(axis=0)
    dv = d_V ** -0.5
    de = d_E ** -1.0
    Hn = H * dv[:, None]
    return (Hn * de[None, :]) @ Hn.T


if __name__ == "__main__":
    key = jax.random.PRNGKey(0)
    k_h, k_x, k_w1, k_b1, k_w2, k_b2 = jax.random.split(key, 6)

    # Small shapes consistent with the module's forward (hidden_dims=16).
    N = 300         # number of nodes
    E = 64          # number of hyperedges
    in_size = 32
    hidden = 16
    out_size = 8

    # Random binary incidence matrix H [N, E]; ensure no zero row/column
    # (so d_V^{-1/2} and d_E^{-1} are finite).
    H = (jax.random.uniform(k_h, (N, E)) > 0.5).astype(jnp.float32)
    row_idx = jnp.arange(N)
    H = H.at[row_idx, row_idx % E].set(1.0)

    L = build_laplacian(H)
    X = jax.random.normal(k_x, (N, in_size), dtype=jnp.float32)

    # Deterministic parameter init (PyTorch Linear-style uniform bounds).
    bound1 = 1.0 / (in_size ** 0.5)
    W1 = jax.random.uniform(k_w1, (in_size, hidden), minval=-bound1, maxval=bound1,
                            dtype=jnp.float32)
    b1 = jax.random.uniform(k_b1, (1, hidden), minval=-bound1, maxval=bound1,
                            dtype=jnp.float32)
    bound2 = 1.0 / (hidden ** 0.5)
    W2 = jax.random.uniform(k_w2, (hidden, out_size), minval=-bound2, maxval=bound2,
                            dtype=jnp.float32)
    b2 = jax.random.uniform(k_b2, (1, out_size), minval=-bound2, maxval=bound2,
                            dtype=jnp.float32)

    out = hgnn_forward(L, X, W1, b1, W2, b2)
    out = jax.block_until_ready(out)

    # Pure-JAX f32 reference (kernel feeds L / activations to the MXU in bf16,
    # accumulating in f32 -> modest tolerance).
    h1_ref = jnp.maximum(L @ (X @ W1 + b1), 0.0)
    ref = L @ (h1_ref @ W2 + b2)
    assert out.shape == (N, out_size)
    assert jnp.allclose(out, ref, atol=2e-2, rtol=2e-2), \
        float(jnp.max(jnp.abs(out - ref)))

    print("KERNEL_OK")
</pallas_src>

<mosaic_0001>
module attributes {stable_mosaic.version = 11 : i64} {
  func.func @_layer1_fused_kernel(%arg0: i32, %arg1: i32, %arg2: memref<384x384xbf16, #tpu.memory_space<vmem>>, %arg3: memref<384x128xbf16, #tpu.memory_space<vmem>>, %arg4: memref<128x128xbf16, #tpu.memory_space<vmem>>, %arg5: memref<1x128xf32, #tpu.memory_space<vmem>>, %arg6: memref<384x128xbf16, #tpu.memory_space<vmem>>, %arg7: memref<384x128xf32, #tpu.memory_space<vmem>>) attributes {dimension_semantics = [#tpu.dimension_semantics<parallel>, #tpu.dimension_semantics<arbitrary>], iteration_bounds = array<i64: 1, 1>, scalar_prefetch = 0 : i64, scratch_operands = 1 : i64, tpu.core_type = #tpu.core_type<tc>, window_params = [{transform_indices = @transform_0, window_bounds = array<i64: 384, 384>}, {transform_indices = @transform_1, window_bounds = array<i64: 384, 128>}, {pipeline_mode = #tpu.pipeline_mode<synchronous>, transform_indices = @transform_2, window_bounds = array<i64: 128, 128>}, {pipeline_mode = #tpu.pipeline_mode<synchronous>, transform_indices = @transform_3, window_bounds = array<i64: 1, 128>}, {transform_indices = @transform_4, window_bounds = array<i64: 384, 128>}]} {
    %c0_i32 = arith.constant 0 : i32
    %0 = arith.cmpi eq, %arg1, %c0_i32 : i32
    %1 = arith.extui %0 : i1 to i32
    %c0_i32_0 = arith.constant 0 : i32
    %2 = arith.cmpi ne, %1, %c0_i32_0 : i32
    scf.if %2 {
      %cst_10 = arith.constant 0.000000e+00 : f32
      %12 = vector.broadcast %cst_10 : f32 to vector<384x128xf32>
      %c0_11 = arith.constant 0 : index
      %c0_12 = arith.constant 0 : index
      %13 = vector.load %arg7[%c0_11, %c0_12] : memref<384x128xf32, #tpu.memory_space<vmem>>, vector<384x128xf32>
      tpu.vector_store %arg7[%c0_11, %c0_12], %12 {strides = array<i32>} : memref<384x128xf32, #tpu.memory_space<vmem>>, vector<384x128xf32>,
    } else {
    }
    %c0 = arith.constant 0 : index
    %c0_1 = arith.constant 0 : index
    %3 = vector.load %arg7[%c0, %c0_1] : memref<384x128xf32, #tpu.memory_space<vmem>>, vector<384x128xf32>
    %c0_2 = arith.constant 0 : index
    %c0_3 = arith.constant 0 : index
    %4 = vector.load %arg2[%c0_2, %c0_3] : memref<384x384xbf16, #tpu.memory_space<vmem>>, vector<384x384xbf16>
    %c0_4 = arith.constant 0 : index
    %c0_5 = arith.constant 0 : index
    %5 = vector.load %arg3[%c0_4, %c0_5] : memref<384x128xbf16, #tpu.memory_space<vmem>>, vector<384x128xbf16>
    %cst = arith.constant dense<0.000000e+00> : vector<384x128xf32>
    %6 = tpu.matmul %4, %5, %cst {dimension_numbers = #tpu.dot_dimension_numbers<[1], [0], [0], [1], [0, 0, 1, 1], [], []>} : vector<384x384xbf16>, vector<384x128xbf16>, vector<384x128xf32> -> vector<384x128xf32>
    %7 = arith.addf %3, %6 : vector<384x128xf32>
    %c0_6 = arith.constant 0 : index
    %c0_7 = arith.constant 0 : index
    %8 = vector.load %arg7[%c0_6, %c0_7] : memref<384x128xf32, #tpu.memory_space<vmem>>, vector<384x128xf32>
    tpu.vector_store %arg7[%c0_6, %c0_7], %7 {strides = array<i32>} : memref<384x128xf32, #tpu.memory_space<vmem>>, vector<384x128xf32>,
    %c0_i32_8 = arith.constant 0 : i32
    %9 = arith.cmpi eq, %arg1, %c0_i32_8 : i32
    %10 = arith.extui %9 : i1 to i32
    %c0_i32_9 = arith.constant 0 : i32
    %11 = arith.cmpi ne, %10, %c0_i32_9 : i32
    scf.if %11 {
      %c0_10 = arith.constant 0 : index
      %c0_11 = arith.constant 0 : index
      %12 = vector.load %arg7[%c0_10, %c0_11] : memref<384x128xf32, #tpu.memory_space<vmem>>, vector<384x128xf32>
      %cst_12 = arith.constant 0.000000e+00 : f32
      %13 = vector.broadcast %cst_12 : f32 to vector<384x128xf32>
      %14 = arith.maximumf %12, %13 : vector<384x128xf32>
      %15 = arith.truncf %14 : vector<384x128xf32> to vector<384x128xbf16>
      %c0_13 = arith.constant 0 : index
      %c0_14 = arith.constant 0 : index
      %16 = vector.load %arg4[%c0_13, %c0_14] : memref<128x128xbf16, #tpu.memory_space<vmem>>, vector<128x128xbf16>
      %cst_15 = arith.constant dense<0.000000e+00> : vector<384x128xf32>
      %17 = tpu.matmul %15, %16, %cst_15 {dimension_numbers = #tpu.dot_dimension_numbers<[1], [0], [0], [1], [0, 0, 1, 1], [], []>} : vector<384x128xbf16>, vector<128x128xbf16>, vector<384x128xf32> -> vector<384x128xf32>
      %c0_16 = arith.constant 0 : index
      %c0_17 = arith.constant 0 : index
      %18 = vector.load %arg5[%c0_16, %c0_17] : memref<1x128xf32, #tpu.memory_space<vmem>>, vector<1x128xf32>
      %19 = vector.broadcast %18 : vector<1x128xf32> to vector<384x128xf32>
      %20 = arith.addf %17, %19 : vector<384x128xf32>
      %21 = arith.truncf %20 : vector<384x128xf32> to vector<384x128xbf16>
      %c0_18 = arith.constant 0 : index
      %c0_19 = arith.constant 0 : index
      %22 = vector.load %arg6[%c0_18, %c0_19] : memref<384x128xbf16, #tpu.memory_space<vmem>>, vector<384x128xbf16>
      tpu.vector_store %arg6[%c0_18, %c0_19], %21 {strides = array<i32>} : memref<384x128xbf16, #tpu.memory_space<vmem>>, vector<384x128xbf16>,
    } else {
    }
    return
  }
  func.func @transform_0(%arg0: i32, %arg1: i32) -> (i32, i32) {
    %c0_i32 = arith.constant 0 : i32
    return %arg0, %arg1 : i32, i32
  }
  func.func @transform_1(%arg0: i32, %arg1: i32) -> (i32, i32) {
    %c0_i32 = arith.constant 0 : i32
    %c0_i32_0 = arith.constant 0 : i32
    return %arg1, %c0_i32 : i32, i32
  }
  func.func @transform_2(%arg0: i32, %arg1: i32) -> (i32, i32) {
    %c0_i32 = arith.constant 0 : i32
    %c0_i32_0 = arith.constant 0 : i32
    %c0_i32_1 = arith.constant 0 : i32
    return %c0_i32, %c0_i32_0 : i32, i32
  }
  func.func @transform_3(%arg0: i32, %arg1: i32) -> (i32, i32) {
    %c0_i32 = arith.constant 0 : i32
    %c0_i32_0 = arith.constant 0 : i32
    %c0_i32_1 = arith.constant 0 : i32
    return %c0_i32, %c0_i32_0 : i32, i32
  }
  func.func @transform_4(%arg0: i32, %arg1: i32) -> (i32, i32) {
    %c0_i32 = arith.constant 0 : i32
    %c0_i32_0 = arith.constant 0 : i32
    return %arg0, %c0_i32 : i32, i32
  }
}

</mosaic_0001>

<bundles_post_ra>
// kernel: tpu_custom_call.1
= control target key start
LH: loop header
LB: loop body
LE: loop exit
PB: predicated region body
PF: predicated region fallthrough
CT: control target
= control target key end

     0   :  { %9 = vsyncpa [#allocation4], 0  ;;  %s2938_s0 = inlined_call_operand.hbm [shape: bf16[384,384], index: 0, kind: input, shape index: {}]   ;;  %s2939_s1 = inlined_call_operand.hbm [shape: bf16[384,128], index: 1, kind: input, shape index: {}]   ;;  %s2940_s2 = inlined_call_operand.hbm [shape: bf16[128,128], index: 2, kind: input, shape index: {}]   ;;  %s2941_s3 = inlined_call_operand.vmem [shape: f32[1,128], index: 3, kind: input, shape index: {}]   ;;  %s2942_s4 = inlined_call_operand.hbm [shape: bf16[384,128], index: 4, kind: output, shape index: {}]  }
   0x1   :  { %10 = vsyncpa [#allocation7], 0 }
   0x2   :  { %11 = vsyncpa [#allocation5], 0  ;;  %s2814_s15 = smov [#allocation6]  }
   0x3   :  { %s29_s16 = sshll.u32 %s2814_s15, 4  ;;  %s30_s16 = int_to_ptr.vmem [resolvable:$true] %s29_s16 }
   0x4   :  { %s2736_s17 = scalar_lea.vmem %s30_s16, 3072  ;;  %p2741_p1 = scmp.lt.s32.totalorder %s30_s16, %s30_s16 }
   0x5   :  { %p2737_p0 = scmp.ne.s32.totalorder %s30_s16, %s2736_s17  ;;  %p2742_p2 = scmp.lt.s32.totalorder %s2736_s17, %s2736_s17 }
   0x7   :  { %p2743_p3 = por %p2742_p2, %p2741_p1 }
   0x9   :  { %p2744_p4 = pnand %p2743_p3, %p2737_p0 }
   0xb   :  { %2747 = shalt.err (!%p2744_p4)
}
   0xc   :  { %s2815_s18 = smov 64   ;;  %s2816_s19 = smov 4  }
   0xd   :  { %35 = dma.hbm_to_vmem [thread:$0]  %s2939_s1, 3072, %s30_s16, [#allocation7], %s2815_s18, %s2815_s18, %s2816_s19  }
   0xe   :  { %s2817_s22 = smov [#allocation3]  }
   0xf   :  { %s17_s23 = sshll.u32 %s2817_s22, 4  ;;  %s18_s23 = int_to_ptr.vmem [resolvable:$true] %s17_s23 }
  0x10   :  { %s2756_s24 = scalar_lea.vmem %s18_s23, 9216  ;;  %p2761_p6 = scmp.lt.s32.totalorder %s18_s23, %s18_s23 }
  0x11   :  { %p2757_p5 = scmp.ne.s32.totalorder %s18_s23, %s2756_s24  ;;  %p2762_p7 = scmp.lt.s32.totalorder %s2756_s24, %s2756_s24 }
  0x13   :  { %p2763_p8 = por %p2762_p7, %p2761_p6 }
  0x15   :  { %p2764_p9 = pnand %p2763_p8, %p2757_p5 }
  0x17   :  { %2767 = shalt.err (!%p2764_p9)
}
  0x18   :  { %s2818_s25 = smov 192   ;;  %s2819_s26 = smov 12  }
  0x19   :  { %23 = dma.hbm_to_vmem [thread:$0]  %s2938_s0, 9216, %s18_s23, [#allocation4], %s2818_s25, %s2818_s25, %s2819_s26  }
  0x1a   :  { %s2820_s29 = smov [#allocation8]  }
  0x1b   :  { %s41_s30 = sshll.u32 %s2820_s29, 4  ;;  %s42_s30 = int_to_ptr.vmem [resolvable:$true] %s41_s30 }
  0x1c   :  { %s2776_s1 = scalar_lea.vmem %s42_s30, 1024  ;;  %p2781_p11 = scmp.lt.s32.totalorder %s42_s30, %s42_s30 }
  0x1d   :  { %p2777_p10 = scmp.ne.s32.totalorder %s42_s30, %s2776_s1  ;;  %p2782_p12 = scmp.lt.s32.totalorder %s2776_s1, %s2776_s1 }
  0x1f   :  { %p2783_p13 = por %p2782_p12, %p2781_p11 }
  0x21   :  { %p2784_p0 = pnand %p2783_p13, %p2777_p10 }
  0x23   :  { %2787 = shalt.err (!%p2784_p0)
}
  0x24   :  { %47 = dma.hbm_to_vmem [thread:$0]  %s2940_s2, 1024, %s42_s30, [#allocation7], %s2815_s18, %s2815_s18, %s2816_s19  }
  0x25   :  { %2808 = dma.done.wait [#allocation4], 9216  }
  0x26   :  { %2809 = vsyncadd [#allocation4], 4294958080 }
  0x27   :  { %2810 = dma.done.wait [#allocation7], 4096  }
  0x28   :  { %2811 = vsyncadd [#allocation7], 4294963200  ;;  %v2821_v0 = vmov 0   ;;  %v2600_v1 = vld [vmem:[#allocation6 + $0x38] sm:$0xff]   ;;  %v2601_v2 = vld [vmem:[#allocation6 + $0x30] sm:$0xff]  }
  0x29   :  { %832 = vmatprep.subr.bf16.mxu0 %v2821_v0  ;;  %v2602_v3 = vld [vmem:[#allocation6 + $0x28] sm:$0xff]   ;;  %v2608_v4 = vld [vmem:[#allocation6 + $0xb8] sm:$0xff]   ;;  %v2603_v5 = vld [vmem:[#allocation6 + $0x20] sm:$0xff]  }
  0x2a   :  { %833 = vmatpush1.bf16.msra.mxu0 %v2600_v1  ;;  %2463 = vmatprep.subr.bf16.mxu1 %v2608_v4  ;;  %v2610_v6 = vld [vmem:[#allocation6 + $0xb0] sm:$0xff]   ;;  %v2612_v7 = vld [vmem:[#allocation6 + $0xa8] sm:$0xff]   ;;  %v2604_v8 = vld [vmem:[#allocation6 + $0x18] sm:$0xff]  }
  0x2b   :  { %834 = vmatprep.subr.bf16.mxu0 %v2821_v0  ;;  %2464 = vmatpush3.bf16.msra.mxu1 %v2608_v4  ;;  %v2614_v9 = vld [vmem:[#allocation6 + $0xa0] sm:$0xff]   ;;  %v2605_v10 = vld [vmem:[#allocation6 + $0x10] sm:$0xff]   ;;  %v2616_v11 = vld [vmem:[#allocation6 + $0x98] sm:$0xff]  }
  0x2c   :  { %2465 = vmatprep.subr.bf16.mxu1 %v2610_v6  ;;  %v2606_v12 = vld [vmem:[#allocation6 + $0x8] sm:$0xff]   ;;  %v2618_v13 = vld [vmem:[#allocation6 + $0x90] sm:$0xff]   ;;  %v2607_v15 = vld [vmem:[#allocation6] sm:$0xff]  }
  0x2d   :  { %v2624_v14 = vld [vmem:[#allocation3 + $0x8] ss:$12 sps:$4 sm:$0xff]   ;;  %v2628_v16 = vld [vmem:[#allocation3 + $0x4] ss:$12 sps:$4 sm:$0xff]   ;;  %v2609_v18 = vld [vmem:[#allocation6 + $0x78] sm:$0xff]  }
  0x2e   :  { %835 = vmatpush1.bf16.msra.mxu0 %v2601_v2  ;;  %2479 = vmatprep.mubr.bf16.mxu1 %v2624_v14  ;;  %v2620_v17 = vld [vmem:[#allocation6 + $0x88] sm:$0xff]   ;;  %v2622_v19 = vld [vmem:[#allocation6 + $0x80] sm:$0xff]   ;;  %v2611_v20 = vld [vmem:[#allocation6 + $0x70] sm:$0xff]  }
  0x2f   :  { %836 = vmatprep.subr.bf16.mxu0 %v2821_v0  ;;  %2466 = vmatpush3.bf16.msra.mxu1 %v2610_v6  ;;  %v2613_v21 = vld [vmem:[#allocation6 + $0x68] sm:$0xff]   ;;  %v2632_v23 = vld [vmem:[#allocation3 + $0x38] ss:$12 sps:$4 sm:$0xff]   ;;  %v2633_v26 = vld [vmem:[#allocation3 + $0x50] ss:$12 sps:$4 sm:$0xff]  }
  0x30   :  { %2467 = vmatprep.subr.bf16.mxu1 %v2612_v7  ;;  %864 = vmatprep.mubr.bf16.mxu0 %v2628_v16  ;;  %v2625_v22 = vld [vmem:[#allocation3 + $0x20] ss:$12 sps:$4 sm:$0xff]   ;;  %v2617_v25 = vld [vmem:[#allocation6 + $0x58] sm:$0xff]   ;;  %v2640_v27 = vld [vmem:[#allocation3 + $0x68] ss:$12 sps:$4 sm:$0xff]  }
  0x31   :  { %v2615_v24 = vld [vmem:[#allocation6 + $0x60] sm:$0xff]   ;;  %v2619_v28 = vld [vmem:[#allocation6 + $0x50] sm:$0xff]   ;;  %v2621_v29 = vld [vmem:[#allocation6 + $0x48] sm:$0xff]  }
  0x32   :  { %837 = vmatpush1.bf16.msra.mxu0 %v2602_v3  ;;  %v2641_v30 = vld [vmem:[#allocation3 + $0x80] ss:$12 sps:$4 sm:$0xff]   ;;  %v2648_v31 = vld [vmem:[#allocation3 + $0x98] ss:$12 sps:$4 sm:$0xff]   ;;  %v2629_v34 = vld [vmem:[#allocation3 + $0x1c] ss:$12 sps:$4 sm:$0xff]  }
  0x33   :  { %838 = vmatprep.subr.bf16.mxu0 %v2821_v0  ;;  %2468 = vmatpush3.bf16.msra.mxu1 %v2612_v7  ;;  %v2623_v32 = vld [vmem:[#allocation6 + $0x40] sm:$0xff]   ;;  %v2649_v35 = vld [vmem:[#allocation3 + $0xb0] ss:$12 sps:$4 sm:$0xff]   ;;  %v2656_v36 = vld [vmem:[#allocation3 + $0xc8] ss:$12 sps:$4 sm:$0xff]  }
  0x34   :  { %2469 = vmatprep.subr.bf16.mxu1 %v2614_v9  ;;  %v2626_v33 = vld [vmem:[#allocation3] ss:$12 sps:$4 sm:$0xff]   ;;  %v2631_v37 = vld [vmem:[#allocation3 + $0x18] ss:$12 sps:$4 sm:$0xff]   ;;  %v2636_v41 = vld [vmem:[#allocation3 + $0x30] ss:$12 sps:$4 sm:$0xff]  }
  0x35   :  { %v2634_v38 = vld [vmem:[#allocation3 + $0x34] ss:$12 sps:$4 sm:$0xff]   ;;  %v2664_v40 = vld [vmem:[#allocation3 + $0xf8] ss:$12 sps:$4 sm:$0xff]   ;;  %v2665_v43 = vld [vmem:[#allocation3 + $0x110] ss:$12 sps:$4 sm:$0xff]  }
  0x36   :  { %839 = vmatpush1.bf16.msra.mxu0 %v2603_v5  ;;  %v2657_v39 = vld [vmem:[#allocation3 + $0xe0] ss:$12 sps:$4 sm:$0xff]   ;;  %v2672_v44 = vld [vmem:[#allocation3 + $0x128] ss:$12 sps:$4 sm:$0xff]   ;;  %v2642_v46 = vld [vmem:[#allocation3 + $0x64] ss:$12 sps:$4 sm:$0xff]  }
  0x37   :  { %840 = vmatprep.subr.bf16.mxu0 %v2821_v0  ;;  %2470 = vmatpush3.bf16.msra.mxu1 %v2614_v9  ;;  %v2637_v42 = vld [vmem:[#allocation3 + $0x4c] ss:$12 sps:$4 sm:$0xff]   ;;  %v2639_v45 = vld [vmem:[#allocation3 + $0x48] ss:$12 sps:$4 sm:$0xff]   ;;  %v2681_v51 = vld [vmem:[#allocation3 + $0x170] ss:$12 sps:$4 sm:$0xff]  }
  0x38   :  { %2471 = vmatprep.subr.bf16.mxu1 %v2616_v11  ;;  %v2673_v47 = vld [vmem:[#allocation3 + $0x140] ss:$12 sps:$4 sm:$0xff]   ;;  %v2680_v48 = vld [vmem:[#allocation3 + $0x158] ss:$12 sps:$4 sm:$0xff]   ;;  %v2645_v50 = vld [vmem:[#allocation3 + $0x7c] ss:$12 sps:$4 sm:$0xff]  }
  0x39   :  { %v2644_v49 = vld [vmem:[#allocation3 + $0x60] ss:$12 sps:$4 sm:$0xff]   ;;  %v2688_v52 = vld [vmem:[#allocation3 + $0x188] ss:$12 sps:$4 sm:$0xff]   ;;  %v2647_v53 = vld [vmem:[#allocation3 + $0x78] ss:$12 sps:$4 sm:$0xff]  }
  0x3a   :  { %841 = vmatpush1.bf16.msra.mxu0 %v2604_v8  ;;  %v2650_v54 = vld [vmem:[#allocation3 + $0x94] ss:$12 sps:$4 sm:$0xff]   ;;  %v2696_v56 = vld [vmem:[#allocation3 + $0x1b8] ss:$12 sps:$4 sm:$0xff]   ;;  %v2652_v57 = vld [vmem:[#allocation3 + $0x90] ss:$12 sps:$4 sm:$0xff]  }
  0x3b   :  { %842 = vmatprep.subr.bf16.mxu0 %v2821_v0  ;;  %2472 = vmatpush3.bf16.msra.mxu1 %v2616_v11  ;;  %v2689_v55 = vld [vmem:[#allocation3 + $0x1a0] ss:$12 sps:$4 sm:$0xff]   ;;  %v2697_v59 = vld [vmem:[#allocation3 + $0x1d0] ss:$12 sps:$4 sm:$0xff]   ;;  %v2704_v60 = vld [vmem:[#allocation3 + $0x1e8] ss:$12 sps:$4 sm:$0xff]  }
  0x3c   :  { %2473 = vmatprep.subr.bf16.mxu1 %v2618_v13  ;;  %v2653_v58 = vld [vmem:[#allocation3 + $0xac] ss:$12 sps:$4 sm:$0xff]   ;;  %v2720_v62 = vld [vmem:[#allocation8 + $0x30] sm:$0xff]   ;;  %v2723_v4 = vld [vmem:[#allocation8 + $0x20] sm:$0xff]  }
  0x3d   :  { %v2717_v61 = vld [vmem:[#allocation8 + $0x38] sm:$0xff]   ;;  %v2655_v63 = vld [vmem:[#allocation3 + $0xa8] ss:$12 sps:$4 sm:$0xff]   ;;  %v2705_v1 = vld [vmem:[#allocation3 + $0x200] ss:$12 sps:$4 sm:$0xff]  }
  0x3e   :  { %843 = vmatpush1.bf16.msra.mxu0 %v2605_v10  ;;  %v2712_v2 = vld [vmem:[#allocation3 + $0x218] ss:$12 sps:$4 sm:$0xff]   ;;  %v2722_v3 = vld [vmem:[#allocation8 + $0x28] sm:$0xff]   ;;  %v2713_v7 = vld [vmem:[#allocation3 + $0x230] ss:$12 sps:$4 sm:$0xff]  }
  0x3f   :  { %844 = vmatprep.subr.bf16.mxu0 %v2821_v0  ;;  %2474 = vmatpush3.bf16.msra.mxu1 %v2618_v13  ;;  %v2660_v5 = vld [vmem:[#allocation3 + $0xc0] ss:$12 sps:$4 sm:$0xff]   ;;  %v2661_v6 = vld [vmem:[#allocation3 + $0xdc] ss:$12 sps:$4 sm:$0xff]   ;;  %v2663_v9 = vld [vmem:[#allocation3 + $0xd8] ss:$12 sps:$4 sm:$0xff]  }
  0x40   :  { %2475 = vmatprep.subr.bf16.mxu1 %v2620_v17  ;;  %v2724_v8 = vld [vmem:[#allocation8 + $0x18] sm:$0xff]   ;;  %v2666_v10 = vld [vmem:[#allocation3 + $0xf4] ss:$12 sps:$4 sm:$0xff]  }
  0x41   :  { %v2725_v11 = vld [vmem:[#allocation8 + $0x10] sm:$0xff]   ;;  %v2669_v14 = vld [vmem:[#allocation3 + $0x10c] ss:$12 sps:$4 sm:$0xff]  }
  0x42   :  { %845 = vmatpush1.bf16.msra.mxu0 %v2606_v12  ;;  %v2726_v12 = vld [vmem:[#allocation8 + $0x8] sm:$0xff]   ;;  %v2668_v13 = vld [vmem:[#allocation3 + $0xf0] ss:$12 sps:$4 sm:$0xff]  }
  0x43   :  { %846 = vmatprep.subr.bf16.mxu0 %v2821_v0  ;;  %2476 = vmatpush3.bf16.msra.mxu1 %v2620_v17  ;;  %v2671_v16 = vld [vmem:[#allocation3 + $0x108] ss:$12 sps:$4 sm:$0xff]   ;;  %v2674_v17 = vld [vmem:[#allocation3 + $0x124] ss:$12 sps:$4 sm:$0xff]  }
  0x44   :  { %2477 = vmatprep.subr.bf16.mxu1 %v2622_v19 }
  0x46   :  { %847 = vmatpush1.bf16.msra.mxu0 %v2607_v15  ;;  %v2727_v15 = vld [vmem:[#allocation8] sm:$0xff]  }
  0x47   :  { %848 = vmatprep.subr.bf16.mxu0 %v2821_v0  ;;  %2478 = vmatpush3.bf16.msra.mxu1 %v2622_v19  ;;  %v2677_v19 = vld [vmem:[#allocation3 + $0x13c] ss:$12 sps:$4 sm:$0xff]  }
  0x48   :  { %2527 = vmatprep.subr.bf16.mxu1 %v2717_v61 }
  0x4a   :  { %849 = vmatpush2.bf16.msra.mxu0 %v2609_v18  ;;  %2480 = vmatmul.mubr.bf16.vlgmr.msra.gmra.mxu1 %v2625_v22  ;;  %v2676_v18 = vld [vmem:[#allocation3 + $0x120] ss:$12 sps:$4 sm:$0xff]   ;;  %v2684_v22 = vld [vmem:[#allocation3 + $0x150] ss:$12 sps:$4 sm:$0xff]  }
  0x4b   :  { %850 = vmatprep.subr.bf16.mxu0 %v2821_v0  ;;  %2483 = vmatprep.mubr.bf16.mxu1 %v2632_v23  ;;  %v2685_v23 = vld [vmem:[#allocation3 + $0x16c] ss:$12 sps:$4 sm:$0xff]  }
  0x4c   :  { %2528 = vmatpush3.bf16.msra.mxu1 %v2717_v61 }
  0x4d   :  { %2529 = vmatprep.subr.bf16.mxu1 %v2720_v62 }
  0x4e   :  { %851 = vmatpush2.bf16.msra.mxu0 %v2611_v20  ;;  %v2679_v20 = vld [vmem:[#allocation3 + $0x138] ss:$12 sps:$4 sm:$0xff]  }
  0x4f   :  { %852 = vmatprep.subr.bf16.mxu0 %v2821_v0 }
  0x50   :  { %2530 = vmatpush3.bf16.msra.mxu1 %v2720_v62 }
  0x51   :  { %2531 = vmatprep.subr.bf16.mxu1 %v2722_v3 }
  0x52   :  { %853 = vmatpush2.bf16.msra.mxu0 %v2613_v21  ;;  %2484 = vmatmul.mubr.bf16.gmra.mxu1 %v2633_v26  ;;  %v2682_v21 = vld [vmem:[#allocation3 + $0x154] ss:$12 sps:$4 sm:$0xff]  }
  0x53   :  { %854 = vmatprep.subr.bf16.mxu0 %v2821_v0  ;;  %2487 = vmatprep.mubr.bf16.mxu1 %v2640_v27  ;;  %v2692_v26 = vld [vmem:[#allocation3 + $0x180] ss:$12 sps:$4 sm:$0xff]   ;;  %v2693_v27 = vld [vmem:[#allocation3 + $0x19c] ss:$12 sps:$4 sm:$0xff]  }
  0x54   :  { %2532 = vmatpush3.bf16.msra.mxu1 %v2722_v3 }
  0x55   :  { %2533 = vmatprep.subr.bf16.mxu1 %v2723_v4 }
  0x56   :  { %855 = vmatpush2.bf16.msra.mxu0 %v2615_v24  ;;  %v2687_v24 = vld [vmem:[#allocation3 + $0x168] ss:$12 sps:$4 sm:$0xff]  }
  0x57   :  { %856 = vmatprep.subr.bf16.mxu0 %v2821_v0 }
  0x58   :  { %2534 = vmatpush3.bf16.msra.mxu1 %v2723_v4 }
  0x59   :  { %2535 = vmatprep.subr.bf16.mxu1 %v2724_v8 }
  0x5a   :  { %857 = vmatpush2.bf16.msra.mxu0 %v2617_v25  ;;  %2488 = vmatmul.mubr.bf16.gmra.mxu1 %v2641_v30  ;;  %v2690_v25 = vld [vmem:[#allocation3 + $0x184] ss:$12 sps:$4 sm:$0xff]  }
  0x5b   :  { %858 = vmatprep.subr.bf16.mxu0 %v2821_v0  ;;  %2491 = vmatprep.mubr.bf16.mxu1 %v2648_v31  ;;  %v2700_v30 = vld [vmem:[#allocation3 + $0x1b0] ss:$12 sps:$4 sm:$0xff]   ;;  %v2701_v31 = vld [vmem:[#allocation3 + $0x1cc] ss:$12 sps:$4 sm:$0xff]  }
  0x5c   :  { %2536 = vmatpush3.bf16.msra.mxu1 %v2724_v8 }
  0x5d   :  { %2537 = vmatprep.subr.bf16.mxu1 %v2725_v11 }
  0x5e   :  { %859 = vmatpush2.bf16.msra.mxu0 %v2619_v28  ;;  %v2695_v28 = vld [vmem:[#allocation3 + $0x198] ss:$12 sps:$4 sm:$0xff]  }
  0x5f   :  { %860 = vmatprep.subr.bf16.mxu0 %v2821_v0 }
  0x60   :  { %2538 = vmatpush3.bf16.msra.mxu1 %v2725_v11 }
  0x61   :  { %2539 = vmatprep.subr.bf16.mxu1 %v2726_v12 }
  0x62   :  { %861 = vmatpush2.bf16.msra.mxu0 %v2621_v29  ;;  %2492 = vmatmul.mubr.bf16.gmra.mxu1 %v2649_v35  ;;  %v2698_v29 = vld [vmem:[#allocation3 + $0x1b4] ss:$12 sps:$4 sm:$0xff]   ;;  %v2709_v35 = vld [vmem:[#allocation3 + $0x1fc] ss:$12 sps:$4 sm:$0xff]  }
  0x63   :  { %862 = vmatprep.subr.bf16.mxu0 %v2821_v0  ;;  %2495 = vmatprep.mubr.bf16.mxu1 %v2656_v36  ;;  %v2658_v0 = vld [vmem:[#allocation3 + $0xc4] ss:$12 sps:$4 sm:$0xff]  }
  0x64   :  { %2540 = vmatpush3.bf16.msra.mxu1 %v2726_v12  ;;  %v2711_v36 = vld [vmem:[#allocation3 + $0x1f8] ss:$12 sps:$4 sm:$0xff]  }
  0x65   :  { %2541 = vmatprep.subr.bf16.mxu1 %v2727_v15 }
  0x66   :  { %863 = vmatpush2.bf16.msra.mxu0 %v2623_v32  ;;  %v2703_v32 = vld [vmem:[#allocation3 + $0x1c8] ss:$12 sps:$4 sm:$0xff]  }
  0x68   :  { %2542 = vmatpush3.bf16.msra.mxu1 %v2727_v15 }
  0x69   :  { %865 = vmatmul.mubr.bf16.vlgmr.msra.gmra.mxu0 %v2626_v33  ;;  %v2706_v33 = vld [vmem:[#allocation3 + $0x1e4] ss:$12 sps:$4 sm:$0xff]  }
  0x6a   :  { %872 = vmatprep.mubr.bf16.mxu0 %v2629_v34  ;;  %2496 = vmatmul.mubr.bf16.gmra.mxu1 %v2657_v39  ;;  %v2708_v34 = vld [vmem:[#allocation3 + $0x1e0] ss:$12 sps:$4 sm:$0xff]  }
  0x6b   :  { %2499 = vmatprep.mubr.bf16.mxu1 %v2664_v40  ;;  %v2718_v39 = vld [vmem:[#allocation3 + $0x22c] ss:$12 sps:$4 sm:$0xff]   ;;  %v2721_v40 = vld [vmem:[#allocation3 + $0x228] ss:$12 sps:$4 sm:$0xff]  }
  0x71   :  { %873 = vmatmul.mubr.bf16.gmra.mxu0 %v2631_v37  ;;  %v2714_v37 = vld [vmem:[#allocation3 + $0x214] ss:$12 sps:$4 sm:$0xff]  }
  0x72   :  { %880 = vmatprep.mubr.bf16.mxu0 %v2634_v38  ;;  %2500 = vmatmul.mubr.bf16.gmra.mxu1 %v2665_v43  ;;  %v2716_v38 = vld [vmem:[#allocation3 + $0x210] ss:$12 sps:$4 sm:$0xff]  }
  0x73   :  { %2503 = vmatprep.mubr.bf16.mxu1 %v2672_v44 }
  0x79   :  { %881 = vmatmul.mubr.bf16.gmra.mxu0 %v2636_v41 }
  0x7a   :  { %888 = vmatprep.mubr.bf16.mxu0 %v2637_v42  ;;  %2504 = vmatmul.mubr.bf16.gmra.mxu1 %v2673_v47 }
  0x7b   :  { %2507 = vmatprep.mubr.bf16.mxu1 %v2680_v48 }
  0x81   :  { %889 = vmatmul.mubr.bf16.gmra.mxu0 %v2639_v45 }
  0x82   :  { %896 = vmatprep.mubr.bf16.mxu0 %v2642_v46  ;;  %2508 = vmatmul.mubr.bf16.gmra.mxu1 %v2681_v51 }
  0x83   :  { %2511 = vmatprep.mubr.bf16.mxu1 %v2688_v52 }
  0x89   :  { %897 = vmatmul.mubr.bf16.gmra.mxu0 %v2644_v49 }
  0x8a   :  { %904 = vmatprep.mubr.bf16.mxu0 %v2645_v50  ;;  %2512 = vmatmul.mubr.bf16.gmra.mxu1 %v2689_v55 }
  0x8b   :  { %2515 = vmatprep.mubr.bf16.mxu1 %v2696_v56 }
  0x91   :  { %905 = vmatmul.mubr.bf16.gmra.mxu0 %v2647_v53 }
  0x92   :  { %912 = vmatprep.mubr.bf16.mxu0 %v2650_v54  ;;  %2516 = vmatmul.mubr.bf16.gmra.mxu1 %v2697_v59 }
  0x93   :  { %2519 = vmatprep.mubr.bf16.mxu1 %v2704_v60 }
  0x99   :  { %913 = vmatmul.mubr.bf16.gmra.mxu0 %v2652_v57 }
  0x9a   :  { %920 = vmatprep.mubr.bf16.mxu0 %v2653_v58  ;;  %2520 = vmatmul.mubr.bf16.gmra.mxu1 %v2705_v1 }
  0x9b   :  { %2523 = vmatprep.mubr.bf16.mxu1 %v2712_v2 }
  0xa1   :  { %921 = vmatmul.mubr.bf16.gmra.mxu0 %v2655_v63 }
  0xa2   :  { %928 = vmatprep.mubr.bf16.mxu0 %v2658_v0  ;;  %2524 = vmatmul.mubr.bf16.gmra.mxu1 %v2713_v7 }
  0xa9   :  { %929 = vmatmul.mubr.bf16.gmra.mxu0 %v2660_v5 }
  0xaa   :  { %936 = vmatprep.mubr.bf16.mxu0 %v2661_v6 }
  0xb1   :  { %937 = vmatmul.mubr.bf16.gmra.mxu0 %v2663_v9 }
  0xb2   :  { %944 = vmatprep.mubr.bf16.mxu0 %v2666_v10 }
  0xb9   :  { %945 = vmatmul.mubr.bf16.gmra.mxu0 %v2668_v13 }
  0xba   :  { %952 = vmatprep.mubr.bf16.mxu0 %v2669_v14 }
  0xc1   :  { %953 = vmatmul.mubr.bf16.gmra.mxu0 %v2671_v16 }
  0xc2   :  { %960 = vmatprep.mubr.bf16.mxu0 %v2674_v17 }
  0xc9   :  { %961 = vmatmul.mubr.bf16.gmra.mxu0 %v2676_v18 }
  0xca   :  { %968 = vmatprep.mubr.bf16.mxu0 %v2677_v19 }
  0xd1   :  { %969 = vmatmul.mubr.bf16.gmra.mxu0 %v2679_v20 }
  0xd2   :  { %976 = vmatprep.mubr.bf16.mxu0 %v2682_v21 }
  0xd9   :  { %977 = vmatmul.mubr.bf16.gmra.mxu0 %v2684_v22 }
  0xda   :  { %984 = vmatprep.mubr.bf16.mxu0 %v2685_v23 }
  0xe1   :  { %985 = vmatmul.mubr.bf16.gmra.mxu0 %v2687_v24 }
  0xe2   :  { %992 = vmatprep.mubr.bf16.mxu0 %v2690_v25 }
  0xe9   :  { %993 = vmatmul.mubr.bf16.gmra.mxu0 %v2692_v26 }
  0xea   :  { %1000 = vmatprep.mubr.bf16.mxu0 %v2693_v27 }
  0xf1   :  { %1001 = vmatmul.mubr.bf16.gmra.mxu0 %v2695_v28 }
  0xf2   :  { %1008 = vmatprep.mubr.bf16.mxu0 %v2698_v29 }
  0xf9   :  { %1009 = vmatmul.mubr.bf16.gmra.mxu0 %v2700_v30 }
  0xfa   :  { %1016 = vmatprep.mubr.bf16.mxu0 %v2701_v31 }
 0x101   :  { %1017 = vmatmul.mubr.bf16.gmra.mxu0 %v2703_v32 }
 0x102   :  { %1024 = vmatprep.mubr.bf16.mxu0 %v2706_v33 }
 0x109   :  { %1025 = vmatmul.mubr.bf16.gmra.mxu0 %v2708_v34 }
 0x10a   :  { %1032 = vmatprep.mubr.bf16.mxu0 %v2709_v35  ;;  %v2481_v41 = vpop.f32.mrf.mxu1 }
 0x10c   :  { %v1091_v42 = vpop.f32.mrf.mxu1 }
 0x10e   :  { %v2482_v43 = vpop.f32.mrf.mxu1 }
 0x110   :  { %v1094_v46 = vpop.f32.mrf.mxu1 }
 0x111   :  { %1033 = vmatmul.mubr.bf16.gmra.mxu0 %v2711_v36 }
 0x112   :  { %1040 = vmatprep.mubr.bf16.mxu0 %v2714_v37  ;;  %v2485_v51 = vpop.f32.mrf.mxu1 }
 0x114   :  { %v1107_v57 = vpop.f32.mrf.mxu1 }
 0x116   :  { %v2486_v62 = vpop.f32.mrf.mxu1 }
 0x118   :  { %v1110_v4 = vpop.f32.mrf.mxu1 }
 0x119   :  { %1041 = vmatmul.mubr.bf16.gmra.mxu0 %v2716_v38 }
 0x11a   :  { %1048 = vmatprep.mubr.bf16.mxu0 %v2718_v39  ;;  %v2489_v9 = vpop.f32.mrf.mxu1 }
 0x11c   :  { %v1123_v15 = vpop.f32.mrf.mxu1 }
 0x11e   :  { %v2490_v20 = vpop.f32.mrf.mxu1 }
 0x120   :  { %v1126_v26 = vpop.f32.mrf.mxu1 }
 0x121   :  { %1049 = vmatmul.mubr.bf16.gmra.mxu0 %v2721_v40 }
 0x122   :  { %v2493_v31 = vpop.f32.mrf.mxu1 }
 0x124   :  { %v1139_v37 = vpop.f32.mrf.mxu1 }
 0x129   :  { %v866_v44 = vpop.f32.mrf.mxu0 }
 0x12a   :  { %v1092_v47 = vadd.f32 %v1091_v42, %v866_v44  ;;  %v2494_v42 = vpop.f32.mrf.mxu1 }
 0x12b   :  { %v868_v45 = vpop.f32.mrf.mxu0 }
 0x12c   :  { %v1429_v52 = vmax.f32 %v1092_v47, 0.0 }
 0x12d   :  { %v869_v48 = vpop.f32.mrf.mxu0 }
 0x12e   :  { %v1095_v49 = vadd.f32 %v1094_v46, %v869_v48  ;;  %v1142_v48 = vpop.f32.mrf.mxu1 }
 0x12f   :  { %v871_v50 = vpop.f32.mrf.mxu0 }
 0x130   :  { %v1430_v53 = vmax.f32 %v1095_v49, 0.0 }
 0x131   :  { %v874_v54 = vpop.f32.mrf.mxu0 }
 0x132   :  { %v1477_v55 = vpack.c.bf16 %v1430_v53, %v1429_v52  ;;  %v1100_v58 = vadd.f32 %v2481_v41, %v874_v54  ;;  %v2497_v53 = vpop.f32.mrf.mxu1 }
 0x133   :  { %v876_v56 = vpop.f32.mrf.mxu0 }
 0x134   :  { %2543 = vmatprep.mubr.bf16.mxu1 %v1477_v55  ;;  %v1431_v63 = vmax.f32 %v1100_v58, 0.0 }
 0x135   :  { %v877_v59 = vpop.f32.mrf.mxu0 }
 0x136   :  { %v1103_v60 = vadd.f32 %v2482_v43, %v877_v59  ;;  %v1155_v59 = vpop.f32.mrf.mxu1 }
 0x137   :  { %v879_v61 = vpop.f32.mrf.mxu0 }
 0x138   :  { %v1432_v0 = vmax.f32 %v1103_v60, 0.0 }
 0x139   :  { %v882_v1 = vpop.f32.mrf.mxu0 }
 0x13a   :  { %v1478_v2 = vpack.c.bf16 %v1432_v0, %v1431_v63  ;;  %v1108_v5 = vadd.f32 %v1107_v57, %v882_v1  ;;  %v2498_v0 = vpop.f32.mrf.mxu1 }
 0x13b   :  { %v884_v3 = vpop.f32.mrf.mxu0 }
 0x13c   :  { %2544 = vmatmul.mubr.bf16.vlgmr.msra.gmra.mxu1 %v1478_v2  ;;  %v1433_v10 = vmax.f32 %v1108_v5, 0.0 }
 0x13d   :  { %v885_v6 = vpop.f32.mrf.mxu0 }
 0x13e   :  { %v1111_v7 = vadd.f32 %v1110_v4, %v885_v6  ;;  %v1158_v6 = vpop.f32.mrf.mxu1 }
 0x13f   :  { %v887_v8 = vpop.f32.mrf.mxu0 }
 0x140   :  { %v1434_v11 = vmax.f32 %v1111_v7, 0.0 }
 0x141   :  { %v890_v12 = vpop.f32.mrf.mxu0 }
 0x142   :  { %v1479_v13 = vpack.c.bf16 %v1434_v11, %v1433_v10  ;;  %v1116_v16 = vadd.f32 %v2485_v51, %v890_v12  ;;  %v2501_v11 = vpop.f32.mrf.mxu1 }
 0x143   :  { %v892_v14 = vpop.f32.mrf.mxu0 }
 0x144   :  { %2547 = vmatprep.mubr.bf16.mxu1 %v1479_v13  ;;  %v1435_v21 = vmax.f32 %v1116_v16, 0.0 }
 0x145   :  { %v893_v17 = vpop.f32.mrf.mxu0 }
 0x146   :  { %v1119_v18 = vadd.f32 %v2486_v62, %v893_v17  ;;  %v1171_v17 = vpop.f32.mrf.mxu1 }
 0x147   :  { %v895_v19 = vpop.f32.mrf.mxu0 }
 0x148   :  { %v1436_v22 = vmax.f32 %v1119_v18, 0.0 }
 0x149   :  { %v898_v23 = vpop.f32.mrf.mxu0 }
 0x14a   :  { %v1480_v24 = vpack.c.bf16 %v1436_v22, %v1435_v21  ;;  %v1124_v27 = vadd.f32 %v1123_v15, %v898_v23  ;;  %v2502_v22 = vpop.f32.mrf.mxu1 }
 0x14b   :  { %v900_v25 = vpop.f32.mrf.mxu0 }
 0x14c   :  { %2548 = vmatmul.mubr.bf16.gmra.mxu1 %v1480_v24  ;;  %v1437_v32 = vmax.f32 %v1124_v27, 0.0 }
 0x14d   :  { %v901_v28 = vpop.f32.mrf.mxu0 }
 0x14e   :  { %v1127_v29 = vadd.f32 %v1126_v26, %v901_v28  ;;  %v1174_v28 = vpop.f32.mrf.mxu1 }
 0x14f   :  { %v903_v30 = vpop.f32.mrf.mxu0 }
 0x150   :  { %v1438_v33 = vmax.f32 %v1127_v29, 0.0 }
 0x151   :  { %v906_v34 = vpop.f32.mrf.mxu0 }
 0x152   :  { %v1481_v35 = vpack.c.bf16 %v1438_v33, %v1437_v32  ;;  %v1132_v38 = vadd.f32 %v2489_v9, %v906_v34  ;;  %v2505_v33 = vpop.f32.mrf.mxu1 }
 0x153   :  { %v908_v36 = vpop.f32.mrf.mxu0 }
 0x154   :  { %2551 = vmatprep.mubr.bf16.mxu1 %v1481_v35  ;;  %v1439_v43 = vmax.f32 %v1132_v38, 0.0 }
 0x155   :  { %v909_v39 = vpop.f32.mrf.mxu0 }
 0x156   :  { %v1135_v40 = vadd.f32 %v2490_v20, %v909_v39  ;;  %v1187_v39 = vpop.f32.mrf.mxu1 }
 0x157   :  { %v911_v41 = vpop.f32.mrf.mxu0 }
 0x158   :  { %v1440_v44 = vmax.f32 %v1135_v40, 0.0 }
 0x159   :  { %v914_v45 = vpop.f32.mrf.mxu0 }
 0x15a   :  { %v1482_v46 = vpack.c.bf16 %v1440_v44, %v1439_v43  ;;  %v1140_v49 = vadd.f32 %v1139_v37, %v914_v45  ;;  %v2506_v44 = vpop.f32.mrf.mxu1 }
 0x15b   :  { %v916_v47 = vpop.f32.mrf.mxu0 }
 0x15c   :  { %2552 = vmatmul.mubr.bf16.gmra.mxu1 %v1482_v46  ;;  %v1441_v54 = vmax.f32 %v1140_v49, 0.0 }
 0x15d   :  { %v917_v50 = vpop.f32.mrf.mxu0 }
 0x15e   :  { %v1143_v51 = vadd.f32 %v1142_v48, %v917_v50  ;;  %v1190_v50 = vpop.f32.mrf.mxu1 }
 0x15f   :  { %v919_v52 = vpop.f32.mrf.mxu0 }
 0x160   :  { %v1442_v55 = vmax.f32 %v1143_v51, 0.0 }
 0x161   :  { %v922_v56 = vpop.f32.mrf.mxu0 }
 0x162   :  { %v1483_v57 = vpack.c.bf16 %v1442_v55, %v1441_v54  ;;  %v1148_v60 = vadd.f32 %v2493_v31, %v922_v56  ;;  %v2509_v55 = vpop.f32.mrf.mxu1 }
 0x163   :  { %v924_v58 = vpop.f32.mrf.mxu0 }
 0x164   :  { %2555 = vmatprep.mubr.bf16.mxu1 %v1483_v57  ;;  %v1443_v1 = vmax.f32 %v1148_v60, 0.0 }
 0x165   :  { %v925_v61 = vpop.f32.mrf.mxu0 }
 0x166   :  { %v1151_v62 = vadd.f32 %v2494_v42, %v925_v61  ;;  %v1203_v61 = vpop.f32.mrf.mxu1 }
 0x167   :  { %v927_v63 = vpop.f32.mrf.mxu0 }
 0x168   :  { %v1444_v2 = vmax.f32 %v1151_v62, 0.0 }
 0x169   :  { %v930_v3 = vpop.f32.mrf.mxu0 }
 0x16a   :  { %v1484_v4 = vpack.c.bf16 %v1444_v2, %v1443_v1  ;;  %v1156_v7 = vadd.f32 %v1155_v59, %v930_v3  ;;  %v2510_v2 = vpop.f32.mrf.mxu1 }
 0x16b   :  { %v932_v5 = vpop.f32.mrf.mxu0 }
 0x16c   :  { %2556 = vmatmul.mubr.bf16.gmra.mxu1 %v1484_v4  ;;  %v1445_v12 = vmax.f32 %v1156_v7, 0.0 }
 0x16d   :  { %v933_v8 = vpop.f32.mrf.mxu0 }
 0x16e   :  { %v1159_v9 = vadd.f32 %v1158_v6, %v933_v8  ;;  %v1206_v8 = vpop.f32.mrf.mxu1 }
 0x16f   :  { %v935_v10 = vpop.f32.mrf.mxu0 }
 0x170   :  { %v1446_v13 = vmax.f32 %v1159_v9, 0.0 }
 0x171   :  { %v938_v14 = vpop.f32.mrf.mxu0 }
 0x172   :  { %v1485_v15 = vpack.c.bf16 %v1446_v13, %v1445_v12  ;;  %v1164_v18 = vadd.f32 %v2497_v53, %v938_v14  ;;  %v2513_v13 = vpop.f32.mrf.mxu1 }
 0x173   :  { %v940_v16 = vpop.f32.mrf.mxu0 }
 0x174   :  { %2559 = vmatprep.mubr.bf16.mxu1 %v1485_v15  ;;  %v1447_v23 = vmax.f32 %v1164_v18, 0.0 }
 0x175   :  { %v941_v19 = vpop.f32.mrf.mxu0 }
 0x176   :  { %v1167_v20 = vadd.f32 %v2498_v0, %v941_v19  ;;  %v1219_v19 = vpop.f32.mrf.mxu1 }
 0x177   :  { %v943_v21 = vpop.f32.mrf.mxu0 }
 0x178   :  { %v1448_v24 = vmax.f32 %v1167_v20, 0.0 }
 0x179   :  { %v946_v25 = vpop.f32.mrf.mxu0 }
 0x17a   :  { %v1486_v26 = vpack.c.bf16 %v1448_v24, %v1447_v23  ;;  %v1172_v29 = vadd.f32 %v1171_v17, %v946_v25  ;;  %v2514_v24 = vpop.f32.mrf.mxu1 }
 0x17b   :  { %v948_v27 = vpop.f32.mrf.mxu0 }
 0x17c   :  { %2560 = vmatmul.mubr.bf16.gmra.mxu1 %v1486_v26  ;;  %v1449_v34 = vmax.f32 %v1172_v29, 0.0 }
 0x17d   :  { %v949_v30 = vpop.f32.mrf.mxu0 }
 0x17e   :  { %v1175_v31 = vadd.f32 %v1174_v28, %v949_v30  ;;  %v1222_v30 = vpop.f32.mrf.mxu1 }
 0x17f   :  { %v951_v32 = vpop.f32.mrf.mxu0 }
 0x180   :  { %v1450_v35 = vmax.f32 %v1175_v31, 0.0 }
 0x181   :  { %v954_v36 = vpop.f32.mrf.mxu0 }
 0x182   :  { %v1487_v37 = vpack.c.bf16 %v1450_v35, %v1449_v34  ;;  %v1180_v40 = vadd.f32 %v2501_v11, %v954_v36  ;;  %v2517_v35 = vpop.f32.mrf.mxu1 }
 0x183   :  { %v956_v38 = vpop.f32.mrf.mxu0 }
 0x184   :  { %2563 = vmatprep.mubr.bf16.mxu1 %v1487_v37  ;;  %v1451_v45 = vmax.f32 %v1180_v40, 0.0 }
 0x185   :  { %v957_v41 = vpop.f32.mrf.mxu0 }
 0x186   :  { %v1183_v42 = vadd.f32 %v2502_v22, %v957_v41  ;;  %v1235_v41 = vpop.f32.mrf.mxu1 }
 0x187   :  { %v959_v43 = vpop.f32.mrf.mxu0 }
 0x188   :  { %v1452_v46 = vmax.f32 %v1183_v42, 0.0 }
 0x189   :  { %v962_v47 = vpop.f32.mrf.mxu0 }
 0x18a   :  { %v1488_v48 = vpack.c.bf16 %v1452_v46, %v1451_v45  ;;  %v1188_v51 = vadd.f32 %v1187_v39, %v962_v47  ;;  %v2518_v46 = vpop.f32.mrf.mxu1 }
 0x18b   :  { %v964_v49 = vpop.f32.mrf.mxu0 }
 0x18c   :  { %2564 = vmatmul.mubr.bf16.gmra.mxu1 %v1488_v48  ;;  %v1453_v56 = vmax.f32 %v1188_v51, 0.0 }
 0x18d   :  { %v965_v52 = vpop.f32.mrf.mxu0 }
 0x18e   :  { %v1191_v53 = vadd.f32 %v1190_v50, %v965_v52  ;;  %v1238_v52 = vpop.f32.mrf.mxu1 }
 0x18f   :  { %v967_v54 = vpop.f32.mrf.mxu0 }
 0x190   :  { %v1454_v57 = vmax.f32 %v1191_v53, 0.0 }
 0x191   :  { %v970_v58 = vpop.f32.mrf.mxu0 }
 0x192   :  { %v1489_v59 = vpack.c.bf16 %v1454_v57, %v1453_v56  ;;  %v1196_v62 = vadd.f32 %v2505_v33, %v970_v58  ;;  %v2521_v57 = vpop.f32.mrf.mxu1 }
 0x193   :  { %v972_v60 = vpop.f32.mrf.mxu0 }
 0x194   :  { %2567 = vmatprep.mubr.bf16.mxu1 %v1489_v59  ;;  %v1455_v3 = vmax.f32 %v1196_v62, 0.0 }
 0x195   :  { %v973_v63 = vpop.f32.mrf.mxu0 }
 0x196   :  { %v1199_v0 = vadd.f32 %v2506_v44, %v973_v63  ;;  %v1251_v63 = vpop.f32.mrf.mxu1 }
 0x197   :  { %v975_v1 = vpop.f32.mrf.mxu0 }
 0x198   :  { %v1456_v4 = vmax.f32 %v1199_v0, 0.0 }
 0x199   :  { %v978_v5 = vpop.f32.mrf.mxu0 }
 0x19a   :  { %v1490_v6 = vpack.c.bf16 %v1456_v4, %v1455_v3  ;;  %v1204_v9 = vadd.f32 %v1203_v61, %v978_v5  ;;  %v2522_v4 = vpop.f32.mrf.mxu1 }
 0x19b   :  { %v980_v7 = vpop.f32.mrf.mxu0 }
 0x19c   :  { %2568 = vmatmul.mubr.bf16.gmra.mxu1 %v1490_v6  ;;  %v1457_v14 = vmax.f32 %v1204_v9, 0.0 }
 0x19d   :  { %v981_v10 = vpop.f32.mrf.mxu0 }
 0x19e   :  { %v1207_v11 = vadd.f32 %v1206_v8, %v981_v10  ;;  %v1254_v10 = vpop.f32.mrf.mxu1 }
 0x19f   :  { %v983_v12 = vpop.f32.mrf.mxu0 }
 0x1a0   :  { %v1458_v15 = vmax.f32 %v1207_v11, 0.0 }
 0x1a1   :  { %v986_v16 = vpop.f32.mrf.mxu0 }
 0x1a2   :  { %v1491_v17 = vpack.c.bf16 %v1458_v15, %v1457_v14  ;;  %v1212_v20 = vadd.f32 %v2509_v55, %v986_v16  ;;  %v2525_v15 = vpop.f32.mrf.mxu1 }
 0x1a3   :  { %v988_v18 = vpop.f32.mrf.mxu0 }
 0x1a4   :  { %2571 = vmatprep.mubr.bf16.mxu1 %v1491_v17  ;;  %v1459_v25 = vmax.f32 %v1212_v20, 0.0 }
 0x1a5   :  { %v989_v21 = vpop.f32.mrf.mxu0 }
 0x1a6   :  { %v1215_v22 = vadd.f32 %v2510_v2, %v989_v21  ;;  %v1267_v21 = vpop.f32.mrf.mxu1 }
 0x1a7   :  { %v991_v23 = vpop.f32.mrf.mxu0 }
 0x1a8   :  { %v1460_v26 = vmax.f32 %v1215_v22, 0.0 }
 0x1a9   :  { %v994_v27 = vpop.f32.mrf.mxu0 }
 0x1aa   :  { %v1492_v28 = vpack.c.bf16 %v1460_v26, %v1459_v25  ;;  %v1220_v31 = vadd.f32 %v1219_v19, %v994_v27  ;;  %v2526_v26 = vpop.f32.mrf.mxu1 }
 0x1ab   :  { %v996_v29 = vpop.f32.mrf.mxu0 }
 0x1ac   :  { %2572 = vmatmul.mubr.bf16.gmra.mxu1 %v1492_v28  ;;  %v1461_v36 = vmax.f32 %v1220_v31, 0.0 }
 0x1ad   :  { %v997_v32 = vpop.f32.mrf.mxu0 }
 0x1ae   :  { %v1223_v33 = vadd.f32 %v1222_v30, %v997_v32  ;;  %v1270_v32 = vpop.f32.mrf.mxu1 }
 0x1af   :  { %v999_v34 = vpop.f32.mrf.mxu0 }
 0x1b0   :  { %v1462_v37 = vmax.f32 %v1223_v33, 0.0 }
 0x1b1   :  { %v1002_v38 = vpop.f32.mrf.mxu0 }
 0x1b2   :  { %v1493_v39 = vpack.c.bf16 %v1462_v37, %v1461_v36  ;;  %v1228_v42 = vadd.f32 %v2513_v13, %v1002_v38 }
 0x1b3   :  { %v1004_v40 = vpop.f32.mrf.mxu0 }
 0x1b4   :  { %2575 = vmatprep.mubr.bf16.mxu1 %v1493_v39  ;;  %v1463_v47 = vmax.f32 %v1228_v42, 0.0 }
 0x1b5   :  { %v1005_v43 = vpop.f32.mrf.mxu0 }
 0x1b6   :  { %v1231_v44 = vadd.f32 %v2514_v24, %v1005_v43 }
 0x1b7   :  { %v1007_v45 = vpop.f32.mrf.mxu0 }
 0x1b8   :  { %v1464_v48 = vmax.f32 %v1231_v44, 0.0 }
 0x1b9   :  { %v1010_v49 = vpop.f32.mrf.mxu0 }
 0x1ba   :  { %v1494_v50 = vpack.c.bf16 %v1464_v48, %v1463_v47  ;;  %v1236_v53 = vadd.f32 %v1235_v41, %v1010_v49 }
 0x1bb   :  { %v1012_v51 = vpop.f32.mrf.mxu0 }
 0x1bc   :  { %2576 = vmatmul.mubr.bf16.gmra.mxu1 %v1494_v50  ;;  %v1465_v58 = vmax.f32 %v1236_v53, 0.0  ;;  %v2882_v50 = vld [vmem:[%s2941_s3] ss:$0 sm:$0xff]  ;;  %s2822_s3 = smov [#allocation9]  }
 0x1bd   :  { %v1013_v54 = vpop.f32.mrf.mxu0  ;;  %s2042_s7 = sshll.u32 %s2822_s3, 4  ;;  %s2043_s7 = int_to_ptr.vmem [resolvable:$true] %s2042_s7 }
 0x1be   :  { %v1239_v55 = vadd.f32 %v1238_v52, %v1013_v54  ;;  %s2788_s8 = scalar_lea.vmem %s2043_s7, 3072  ;;  %p2793_p2 = scmp.lt.s32.totalorder %s2043_s7, %s2043_s7 }
 0x1bf   :  { %v1015_v56 = vpop.f32.mrf.mxu0  ;;  %p2789_p1 = scmp.ne.s32.totalorder %s2043_s7, %s2788_s8  ;;  %p2794_p3 = scmp.lt.s32.totalorder %s2788_s8, %s2788_s8 }
 0x1c0   :  { %v1466_v59 = vmax.f32 %v1239_v55, 0.0 }
 0x1c1   :  { %v1018_v60 = vpop.f32.mrf.mxu0  ;;  %p2795_p4 = por %p2794_p3, %p2793_p2 }
 0x1c2   :  { %v1495_v61 = vpack.c.bf16 %v1466_v59, %v1465_v58  ;;  %v1244_v0 = vadd.f32 %v2517_v35, %v1018_v60 }
 0x1c3   :  { %v1020_v62 = vpop.f32.mrf.mxu0  ;;  %p2796_p5 = pnand %p2795_p4, %p2789_p1 }
 0x1c4   :  { %2579 = vmatprep.mubr.bf16.mxu1 %v1495_v61  ;;  %v1467_v5 = vmax.f32 %v1244_v0, 0.0 }
 0x1c5   :  { %v1021_v1 = vpop.f32.mrf.mxu0 }
 0x1c6   :  { %v1247_v2 = vadd.f32 %v2518_v46, %v1021_v1 }
 0x1c7   :  { %v1023_v3 = vpop.f32.mrf.mxu0 }
 0x1c8   :  { %v1468_v6 = vmax.f32 %v1247_v2, 0.0 }
 0x1c9   :  { %v1026_v7 = vpop.f32.mrf.mxu0 }
 0x1ca   :  { %v1496_v8 = vpack.c.bf16 %v1468_v6, %v1467_v5  ;;  %v1252_v11 = vadd.f32 %v1251_v63, %v1026_v7 }
 0x1cb   :  { %v1028_v9 = vpop.f32.mrf.mxu0 }
 0x1cc   :  { %2580 = vmatmul.mubr.bf16.gmra.mxu1 %v1496_v8  ;;  %v1469_v16 = vmax.f32 %v1252_v11, 0.0 }
 0x1cd   :  { %v1029_v12 = vpop.f32.mrf.mxu0 }
 0x1ce   :  { %v1255_v13 = vadd.f32 %v1254_v10, %v1029_v12 }
 0x1cf   :  { %v1031_v14 = vpop.f32.mrf.mxu0 }
 0x1d0   :  { %v1470_v17 = vmax.f32 %v1255_v13, 0.0 }
 0x1d1   :  { %v1034_v18 = vpop.f32.mrf.mxu0 }
 0x1d2   :  { %v1497_v19 = vpack.c.bf16 %v1470_v17, %v1469_v16  ;;  %v1260_v22 = vadd.f32 %v2521_v57, %v1034_v18 }
 0x1d3   :  { %v1036_v20 = vpop.f32.mrf.mxu0 }
 0x1d4   :  { %2583 = vmatprep.mubr.bf16.mxu1 %v1497_v19  ;;  %v1471_v27 = vmax.f32 %v1260_v22, 0.0 }
 0x1d5   :  { %v1037_v23 = vpop.f32.mrf.mxu0 }
 0x1d6   :  { %v1263_v24 = vadd.f32 %v2522_v4, %v1037_v23 }
 0x1d7   :  { %v1039_v25 = vpop.f32.mrf.mxu0 }
 0x1d8   :  { %v1472_v28 = vmax.f32 %v1263_v24, 0.0 }
 0x1d9   :  { %v1042_v29 = vpop.f32.mrf.mxu0 }
 0x1da   :  { %v1498_v30 = vpack.c.bf16 %v1472_v28, %v1471_v27  ;;  %v1268_v33 = vadd.f32 %v1267_v21, %v1042_v29 }
 0x1db   :  { %v1044_v31 = vpop.f32.mrf.mxu0 }
 0x1dc   :  { %2584 = vmatmul.mubr.bf16.gmra.mxu1 %v1498_v30  ;;  %v1473_v37 = vmax.f32 %v1268_v33, 0.0 }
 0x1dd   :  { %v1045_v34 = vpop.f32.mrf.mxu0 }
 0x1de   :  { %v1271_v35 = vadd.f32 %v1270_v32, %v1045_v34 }
 0x1df   :  { %v1047_v36 = vpop.f32.mrf.mxu0 }
 0x1e0   :  { %v1474_v38 = vmax.f32 %v1271_v35, 0.0 }
 0x1e1   :  { %v1050_v39 = vpop.f32.mrf.mxu0 }
 0x1e2   :  { %v1499_v40 = vpack.c.bf16 %v1474_v38, %v1473_v37  ;;  %v1276_v42 = vadd.f32 %v2525_v15, %v1050_v39 }
 0x1e3   :  { %v1052_v41 = vpop.f32.mrf.mxu0 }
 0x1e4   :  { %2587 = vmatprep.mubr.bf16.mxu1 %v1499_v40  ;;  %v1475_v46 = vmax.f32 %v1276_v42, 0.0 }
 0x1e5   :  { %v1053_v43 = vpop.f32.mrf.mxu0 }
 0x1e6   :  { %v1279_v44 = vadd.f32 %v2526_v26, %v1053_v43 }
 0x1e7   :  { %v1055_v45 = vpop.f32.mrf.mxu0 }
 0x1e8   :  { %v1476_v47 = vmax.f32 %v1279_v44, 0.0 }
 0x1ea   :  { %v1500_v48 = vpack.c.bf16 %v1476_v47, %v1475_v46 }
 0x1ec   :  { %2588 = vmatmul.mubr.bf16.gmra.mxu1 %v1500_v48 }
 0x1fc   :  { %v2545_v49 = vpop.f32.mrf.mxu1 }
 0x1fd   :  { %v1615_v53 = vadd.f32 %v2545_v49, %v2882_v50 }
 0x1fe   :  { %v1606_v51 = vpop.f32.mrf.mxu1 }
 0x1ff   :  { %v1607_v56 = vadd.f32 %v2882_v50, %v1606_v51 }
 0x200   :  { %v2546_v52 = vpop.f32.mrf.mxu1 }
 0x201   :  { %v1618_v54 = vadd.f32 %v2546_v52, %v2882_v50 }
 0x202   :  { %v1609_v55 = vpop.f32.mrf.mxu1 }
 0x203   :  { %v2264_v57 = vpack.c.bf16 %v1618_v54, %v1615_v53  ;;  %v1610_v58 = vadd.f32 %v2882_v50, %v1609_v55 }
 0x205   :  { %2376 = vst [vmem:[#allocation9 + $0x8] sm:$0xff] %v2264_v57   ;;  %v2259_v59 = vpack.c.bf16 %v1610_v58, %v1607_v56 }
 0x207   :  { %2260 = vst [vmem:[#allocation9] sm:$0xff] %v2259_v59  }
 0x20c   :  { %v2549_v60 = vpop.f32.mrf.mxu1 }
 0x20d   :  { %v1631_v63 = vadd.f32 %v2549_v60, %v2882_v50 }
 0x20e   :  { %v1622_v61 = vpop.f32.mrf.mxu1 }
 0x20f   :  { %v1623_v2 = vadd.f32 %v2882_v50, %v1622_v61 }
 0x210   :  { %v2550_v62 = vpop.f32.mrf.mxu1 }
 0x211   :  { %v1634_v0 = vadd.f32 %v2550_v62, %v2882_v50 }
 0x212   :  { %v1625_v1 = vpop.f32.mrf.mxu1 }
 0x213   :  { %v2274_v3 = vpack.c.bf16 %v1634_v0, %v1631_v63  ;;  %v1626_v4 = vadd.f32 %v2882_v50, %v1625_v1 }
 0x215   :  { %2378 = vst [vmem:[#allocation9 + $0x18] sm:$0xff] %v2274_v3   ;;  %v2269_v5 = vpack.c.bf16 %v1626_v4, %v1623_v2 }
 0x217   :  { %2377 = vst [vmem:[#allocation9 + $0x10] sm:$0xff] %v2269_v5  }
 0x21c   :  { %v2553_v6 = vpop.f32.mrf.mxu1 }
 0x21d   :  { %v1647_v9 = vadd.f32 %v2553_v6, %v2882_v50 }
 0x21e   :  { %v1638_v7 = vpop.f32.mrf.mxu1 }
 0x21f   :  { %v1639_v12 = vadd.f32 %v2882_v50, %v1638_v7 }
 0x220   :  { %v2554_v8 = vpop.f32.mrf.mxu1 }
 0x221   :  { %v1650_v10 = vadd.f32 %v2554_v8, %v2882_v50 }
 0x222   :  { %v1641_v11 = vpop.f32.mrf.mxu1 }
 0x223   :  { %v2284_v13 = vpack.c.bf16 %v1650_v10, %v1647_v9  ;;  %v1642_v14 = vadd.f32 %v2882_v50, %v1641_v11 }
 0x225   :  { %2380 = vst [vmem:[#allocation9 + $0x28] sm:$0xff] %v2284_v13   ;;  %v2279_v15 = vpack.c.bf16 %v1642_v14, %v1639_v12 }
 0x227   :  { %2379 = vst [vmem:[#allocation9 + $0x20] sm:$0xff] %v2279_v15  }
 0x22c   :  { %v2557_v16 = vpop.f32.mrf.mxu1 }
 0x22d   :  { %v1663_v19 = vadd.f32 %v2557_v16, %v2882_v50 }
 0x22e   :  { %v1654_v17 = vpop.f32.mrf.mxu1 }
 0x22f   :  { %v1655_v22 = vadd.f32 %v2882_v50, %v1654_v17 }
 0x230   :  { %v2558_v18 = vpop.f32.mrf.mxu1 }
 0x231   :  { %v1666_v20 = vadd.f32 %v2558_v18, %v2882_v50 }
 0x232   :  { %v1657_v21 = vpop.f32.mrf.mxu1 }
 0x233   :  { %v2294_v23 = vpack.c.bf16 %v1666_v20, %v1663_v19  ;;  %v1658_v24 = vadd.f32 %v2882_v50, %v1657_v21 }
 0x235   :  { %2382 = vst [vmem:[#allocation9 + $0x38] sm:$0xff] %v2294_v23   ;;  %v2289_v25 = vpack.c.bf16 %v1658_v24, %v1655_v22 }
 0x237   :  { %2381 = vst [vmem:[#allocation9 + $0x30] sm:$0xff] %v2289_v25  }
 0x23c   :  { %v2561_v26 = vpop.f32.mrf.mxu1 }
 0x23d   :  { %v1679_v29 = vadd.f32 %v2561_v26, %v2882_v50 }
 0x23e   :  { %v1670_v27 = vpop.f32.mrf.mxu1 }
 0x23f   :  { %v1671_v32 = vadd.f32 %v2882_v50, %v1670_v27 }
 0x240   :  { %v2562_v28 = vpop.f32.mrf.mxu1 }
 0x241   :  { %v1682_v30 = vadd.f32 %v2562_v28, %v2882_v50 }
 0x242   :  { %v1673_v31 = vpop.f32.mrf.mxu1 }
 0x243   :  { %v2304_v33 = vpack.c.bf16 %v1682_v30, %v1679_v29  ;;  %v1674_v34 = vadd.f32 %v2882_v50, %v1673_v31 }
 0x245   :  { %2384 = vst [vmem:[#allocation9 + $0x48] sm:$0xff] %v2304_v33   ;;  %v2299_v35 = vpack.c.bf16 %v1674_v34, %v1671_v32 }
 0x247   :  { %2383 = vst [vmem:[#allocation9 + $0x40] sm:$0xff] %v2299_v35  }
 0x24c   :  { %v2565_v36 = vpop.f32.mrf.mxu1 }
 0x24d   :  { %v1695_v39 = vadd.f32 %v2565_v36, %v2882_v50 }
 0x24e   :  { %v1686_v37 = vpop.f32.mrf.mxu1 }
 0x24f   :  { %v1687_v42 = vadd.f32 %v2882_v50, %v1686_v37 }
 0x250   :  { %v2566_v38 = vpop.f32.mrf.mxu1 }
 0x251   :  { %v1698_v40 = vadd.f32 %v2566_v38, %v2882_v50 }
 0x252   :  { %v1689_v41 = vpop.f32.mrf.mxu1 }
 0x253   :  { %v2314_v43 = vpack.c.bf16 %v1698_v40, %v1695_v39  ;;  %v1690_v44 = vadd.f32 %v2882_v50, %v1689_v41 }
 0x255   :  { %2386 = vst [vmem:[#allocation9 + $0x58] sm:$0xff] %v2314_v43   ;;  %v2309_v45 = vpack.c.bf16 %v1690_v44, %v1687_v42 }
 0x257   :  { %2385 = vst [vmem:[#allocation9 + $0x50] sm:$0xff] %v2309_v45  }
 0x25c   :  { %v2569_v46 = vpop.f32.mrf.mxu1 }
 0x25d   :  { %v1711_v49 = vadd.f32 %v2569_v46, %v2882_v50 }
 0x25e   :  { %v1702_v47 = vpop.f32.mrf.mxu1 }
 0x25f   :  { %v1703_v53 = vadd.f32 %v2882_v50, %v1702_v47 }
 0x260   :  { %v2570_v48 = vpop.f32.mrf.mxu1 }
 0x261   :  { %v1714_v51 = vadd.f32 %v2570_v48, %v2882_v50 }
 0x262   :  { %v1705_v52 = vpop.f32.mrf.mxu1 }
 0x263   :  { %v2324_v54 = vpack.c.bf16 %v1714_v51, %v1711_v49  ;;  %v1706_v55 = vadd.f32 %v2882_v50, %v1705_v52 }
 0x265   :  { %2388 = vst [vmem:[#allocation9 + $0x68] sm:$0xff] %v2324_v54   ;;  %v2319_v56 = vpack.c.bf16 %v1706_v55, %v1703_v53 }
 0x267   :  { %2387 = vst [vmem:[#allocation9 + $0x60] sm:$0xff] %v2319_v56  }
 0x26c   :  { %v2573_v57 = vpop.f32.mrf.mxu1 }
 0x26d   :  { %v1727_v60 = vadd.f32 %v2573_v57, %v2882_v50 }
 0x26e   :  { %v1718_v58 = vpop.f32.mrf.mxu1 }
 0x26f   :  { %v1719_v63 = vadd.f32 %v2882_v50, %v1718_v58 }
 0x270   :  { %v2574_v59 = vpop.f32.mrf.mxu1 }
 0x271   :  { %v1730_v61 = vadd.f32 %v2574_v59, %v2882_v50 }
 0x272   :  { %v1721_v62 = vpop.f32.mrf.mxu1 }
 0x273   :  { %v2334_v0 = vpack.c.bf16 %v1730_v61, %v1727_v60  ;;  %v1722_v1 = vadd.f32 %v2882_v50, %v1721_v62 }
 0x275   :  { %2390 = vst [vmem:[#allocation9 + $0x78] sm:$0xff] %v2334_v0   ;;  %v2329_v2 = vpack.c.bf16 %v1722_v1, %v1719_v63 }
 0x277   :  { %2389 = vst [vmem:[#allocation9 + $0x70] sm:$0xff] %v2329_v2  }
 0x27c   :  { %v2577_v3 = vpop.f32.mrf.mxu1 }
 0x27d   :  { %v1743_v6 = vadd.f32 %v2577_v3, %v2882_v50 }
 0x27e   :  { %v1734_v4 = vpop.f32.mrf.mxu1 }
 0x27f   :  { %v1735_v9 = vadd.f32 %v2882_v50, %v1734_v4 }
 0x280   :  { %v2578_v5 = vpop.f32.mrf.mxu1 }
 0x281   :  { %v1746_v7 = vadd.f32 %v2578_v5, %v2882_v50 }
 0x282   :  { %v1737_v8 = vpop.f32.mrf.mxu1 }
 0x283   :  { %v2344_v10 = vpack.c.bf16 %v1746_v7, %v1743_v6  ;;  %v1738_v11 = vadd.f32 %v2882_v50, %v1737_v8 }
 0x285   :  { %2392 = vst [vmem:[#allocation9 + $0x88] sm:$0xff] %v2344_v10   ;;  %v2339_v12 = vpack.c.bf16 %v1738_v11, %v1735_v9 }
 0x287   :  { %2391 = vst [vmem:[#allocation9 + $0x80] sm:$0xff] %v2339_v12  }
 0x28c   :  { %v2581_v13 = vpop.f32.mrf.mxu1 }
 0x28d   :  { %v1759_v16 = vadd.f32 %v2581_v13, %v2882_v50 }
 0x28e   :  { %v1750_v14 = vpop.f32.mrf.mxu1 }
 0x28f   :  { %v1751_v19 = vadd.f32 %v2882_v50, %v1750_v14 }
 0x290   :  { %v2582_v15 = vpop.f32.mrf.mxu1 }
 0x291   :  { %v1762_v17 = vadd.f32 %v2582_v15, %v2882_v50 }
 0x292   :  { %v1753_v18 = vpop.f32.mrf.mxu1 }
 0x293   :  { %v2354_v20 = vpack.c.bf16 %v1762_v17, %v1759_v16  ;;  %v1754_v21 = vadd.f32 %v2882_v50, %v1753_v18 }
 0x295   :  { %2394 = vst [vmem:[#allocation9 + $0x98] sm:$0xff] %v2354_v20   ;;  %v2349_v22 = vpack.c.bf16 %v1754_v21, %v1751_v19 }
 0x297   :  { %2393 = vst [vmem:[#allocation9 + $0x90] sm:$0xff] %v2349_v22  }
 0x29c   :  { %v2585_v23 = vpop.f32.mrf.mxu1 }
 0x29d   :  { %v1775_v26 = vadd.f32 %v2585_v23, %v2882_v50 }
 0x29e   :  { %v1766_v24 = vpop.f32.mrf.mxu1 }
 0x29f   :  { %v1767_v29 = vadd.f32 %v2882_v50, %v1766_v24 }
 0x2a0   :  { %v2586_v25 = vpop.f32.mrf.mxu1 }
 0x2a1   :  { %v1778_v27 = vadd.f32 %v2586_v25, %v2882_v50 }
 0x2a2   :  { %v1769_v28 = vpop.f32.mrf.mxu1 }
 0x2a3   :  { %v2364_v30 = vpack.c.bf16 %v1778_v27, %v1775_v26  ;;  %v1770_v31 = vadd.f32 %v2882_v50, %v1769_v28 }
 0x2a5   :  { %2396 = vst [vmem:[#allocation9 + $0xa8] sm:$0xff] %v2364_v30   ;;  %v2359_v32 = vpack.c.bf16 %v1770_v31, %v1767_v29 }
 0x2a7   :  { %2395 = vst [vmem:[#allocation9 + $0xa0] sm:$0xff] %v2359_v32  }
 0x2ac   :  { %v2589_v33 = vpop.f32.mrf.mxu1 }
 0x2ad   :  { %v1791_v36 = vadd.f32 %v2589_v33, %v2882_v50 }
 0x2ae   :  { %v1782_v34 = vpop.f32.mrf.mxu1 }
 0x2af   :  { %v1783_v39 = vadd.f32 %v2882_v50, %v1782_v34 }
 0x2b0   :  { %v2590_v35 = vpop.f32.mrf.mxu1 }
 0x2b1   :  { %v1794_v37 = vadd.f32 %v2590_v35, %v2882_v50 }
 0x2b2   :  { %v1785_v38 = vpop.f32.mrf.mxu1 }
 0x2b3   :  { %v2374_v40 = vpack.c.bf16 %v1794_v37, %v1791_v36  ;;  %v1786_v41 = vadd.f32 %v2882_v50, %v1785_v38 }
 0x2b5   :  { %2398 = vst [vmem:[#allocation9 + $0xb8] sm:$0xff] %v2374_v40   ;;  %v2369_v42 = vpack.c.bf16 %v1786_v41, %v1783_v39 }
 0x2b7   :  { %2397 = vst [vmem:[#allocation9 + $0xb0] sm:$0xff] %v2369_v42  }
 0x2b8   :  { %2799 = shalt.err (!%p2796_p5)
}
 0x2b9   :  { %2048 = dma.vmem_to_hbm [thread:$0]  %s2043_s7, 3072, %s2942_s4, [#allocation5], %s2815_s18, %s2815_s18, %s2816_s19  }
 0x2ba   :  { %2812 = dma.done.wait [#allocation5], 3072  }
 0x2bb   :  { %2813 = vsyncadd [#allocation5], 4294964224 }
 0x2bc   :  { %2052 = vsyncpa [#allocation4], 1 }
 0x2bd   :  { %2053 = vsyncpa [#allocation7], 1 }
 0x2be   :  { %2054 = vsyncpa [#allocation5], 1 }

</bundles_post_ra>
